<compile_context>
chip_gen: v6e
topology: v6e:2x2x1
jax: 0.10.0
libtpu: 0.0.40
codegen_flags: <defaults>
</compile_context>

<pallas_src>
import math

import jax
import jax.numpy as jnp
from jax.experimental import pallas as pl
from jax.experimental.pallas import tpu as pltpu


def _leaky_relu(x, slope=0.2):
    return jnp.where(x > 0, x, slope * x)


def _round_up(n, m):
    return ((n + m - 1) // m) * m


def discriminator_kernel(x_ref, w1_ref, b1_ref, w2_ref, b2_ref, w3_ref, b3_ref,
                         o_ref):
    # x tile: (tm, D) bf16.  Weights bf16, biases f32, epilogue math f32.
    x = x_ref[...]
    h1 = jnp.dot(x, w1_ref[...], preferred_element_type=jnp.float32)
    h1 = _leaky_relu(h1 + b1_ref[...])                              # (tm, 512) f32

    h2 = jnp.dot(h1.astype(w2_ref.dtype), w2_ref[...],
                 preferred_element_type=jnp.float32)
    h2 = _leaky_relu(h2 + b2_ref[...])                              # (tm, 256) f32

    # Final Linear(256, 1): N=1 matmul wastes the MXU and produces a
    # lane-width-1 result; do it as a VPU multiply + lane reduction instead.
    w3 = w3_ref[...].astype(jnp.float32)                            # (1, 256)
    h3 = jnp.sum(h2 * w3, axis=-1, keepdims=True) + b3_ref[...]     # (tm, 1)
    o_ref[...] = jax.nn.sigmoid(h3).astype(o_ref.dtype)


def discriminator_forward(img, params, *, block_rows=256):
    """img: (B, C, H, W) float32 (NCHW, like PyTorch). Returns (B, 1) float32."""
    w1, b1, w2, b2, w3, b3 = params
    B = img.shape[0]
    x_flat = img.reshape(B, -1)                                     # (B, D)
    D = x_flat.shape[1]
    H1, H2 = w1.shape[1], w2.shape[1]
    OUT = b3.shape[1]

    # bf16 activations / weights; biases stay f32 (epilogue is f32).
    x_bf = x_flat.astype(jnp.bfloat16)
    w1_bf = w1.astype(jnp.bfloat16)
    w2_bf = w2.astype(jnp.bfloat16)
    w3_bf = w3.astype(jnp.bfloat16)

    # Batch tile: multiple of 16 (bf16 sublane pack), at most block_rows.
    tm = min(block_rows, _round_up(B, 16))
    tm = _round_up(tm, 16)
    Bp = _round_up(B, tm)
    if Bp != B:
        x_bf = jnp.pad(x_bf, ((0, Bp - B), (0, 0)))
    grid = (Bp // tm,)

    # VMEM budget: resident weights + double-buffered x/out tiles + f32
    # intermediates, with 2x headroom, clamped to [16 MiB, 48 MiB].
    vmem_bytes = (
        (D * H1 + H1 * H2 + H2 * OUT) * 2          # bf16 weights (resident)
        + (H1 + H2 + OUT) * 4                      # f32 biases
        + 2 * tm * D * 2                           # x tile, double-buffered
        + 2 * tm * OUT * 4                         # out tile, double-buffered
        + 2 * tm * (H1 + H2) * 4                   # f32 intermediates (generous)
    )
    vmem_limit = int(min(max(2 * vmem_bytes, 16 << 20), 48 << 20))

    cost = pl.CostEstimate(
        flops=2 * Bp * (D * H1 + H1 * H2 + H2 * OUT),
        transcendentals=Bp * OUT,
        bytes_accessed=(Bp * D * 2                                   # x (bf16)
                        + (D * H1 + H1 * H2 + H2 * OUT) * 2          # weights
                        + (H1 + H2 + OUT) * 4                        # biases
                        + Bp * OUT * 4),                             # output
    )

    resident = lambda shape: pl.BlockSpec(shape, lambda i: (0, 0))

    out_padded = pl.pallas_call(
        discriminator_kernel,
        out_shape=jax.ShapeDtypeStruct((Bp, OUT), jnp.float32),
        grid=grid,
        in_specs=[
            pl.BlockSpec((tm, D), lambda i: (i, 0)),   # x tile, walks batch
            resident((D, H1)), resident((1, H1)),      # W1, b1 (resident)
            resident((H1, H2)), resident((1, H2)),     # W2, b2 (resident)
            resident((1, H2)), resident((1, OUT)),     # W3 (as (1,256)), b3
        ],
        out_specs=pl.BlockSpec((tm, OUT), lambda i: (i, 0)),
        compiler_params=pltpu.CompilerParams(
            dimension_semantics=("parallel",),         # megacore shard on v7x
            vmem_limit_bytes=vmem_limit,
        ),
        cost_estimate=cost,
    )(x_bf, w1_bf, b1, w2_bf, b2, w3_bf, b3)

    return out_padded[:B]


def init_params(key, in_dim, dtype=jnp.float32):
    """nn.Linear-style init (uniform +-1/sqrt(fan_in)).
    W1/W2 stored pre-transposed as (in, out); W3 stored as (1, 256) (same as
    PyTorch's (out, in) layout); biases stored as (1, out)."""
    dims = [(in_dim, 512), (512, 256), (256, 1)]
    params = []
    for layer_idx, (fan_in, fan_out) in enumerate(dims):
        key, kw, kb = jax.random.split(key, 3)
        bound = 1.0 / math.sqrt(fan_in)
        if layer_idx < 2:
            w = jax.random.uniform(kw, (fan_in, fan_out), dtype, -bound, bound)
        else:  # final layer kept as (out, in) = (1, 256) for the VPU reduction
            w = jax.random.uniform(kw, (fan_out, fan_in), dtype, -bound, bound)
        b = jax.random.uniform(kb, (1, fan_out), dtype, -bound, bound)
        params.extend([w, b])
    return tuple(params)


def reference_forward(img, params):
    w1, b1, w2, b2, w3, b3 = params
    x = img.reshape(img.shape[0], -1)
    h1 = _leaky_relu(x @ w1 + b1)
    h2 = _leaky_relu(h1 @ w2 + b2)
    return jax.nn.sigmoid(h2 @ w3.T + b3)


if __name__ == "__main__":
    # Small shapes consistent with the module: channels=1, img_size=16 -> D=256.
    B, C, H, W = 2, 1, 16, 16
    key = jax.random.PRNGKey(0)
    k_img, k_par = jax.random.split(key)

    img = jax.random.normal(k_img, (B, C, H, W), dtype=jnp.float32)
    params = init_params(k_par, C * H * W)

    out = jax.block_until_ready(discriminator_forward(img, params))
    ref = reference_forward(img, params)

    assert out.shape == (B, 1), out.shape
    # bf16 weights/activations -> loosened tolerance vs the f32 reference.
    assert jnp.allclose(out, ref, atol=2e-2, rtol=2e-2), (out, ref)

    print("KERNEL_OK")
</pallas_src>

<mosaic_0001>
module attributes {stable_mosaic.version = 11 : i64} {
  func.func @discriminator_kernel(%arg0: i32, %arg1: memref<16x256xbf16, #tpu.memory_space<vmem>>, %arg2: memref<256x512xbf16, #tpu.memory_space<vmem>>, %arg3: memref<1x512xf32, #tpu.memory_space<vmem>>, %arg4: memref<512x256xbf16, #tpu.memory_space<vmem>>, %arg5: memref<1x256xf32, #tpu.memory_space<vmem>>, %arg6: memref<1x256xbf16, #tpu.memory_space<vmem>>, %arg7: memref<1x1xf32, #tpu.memory_space<vmem>>, %arg8: memref<16x1xf32, #tpu.memory_space<vmem>>) attributes {dimension_semantics = [#tpu.dimension_semantics<parallel>], iteration_bounds = array<i64: 1>, scalar_prefetch = 0 : i64, scratch_operands = 0 : i64, tpu.core_type = #tpu.core_type<tc>, window_params = [{transform_indices = @transform_0, window_bounds = array<i64: 16, 256>}, {pipeline_mode = #tpu.pipeline_mode<synchronous>, transform_indices = @transform_1, window_bounds = array<i64: 256, 512>}, {pipeline_mode = #tpu.pipeline_mode<synchronous>, transform_indices = @transform_2, window_bounds = array<i64: 1, 512>}, {pipeline_mode = #tpu.pipeline_mode<synchronous>, transform_indices = @transform_3, window_bounds = array<i64: 512, 256>}, {pipeline_mode = #tpu.pipeline_mode<synchronous>, transform_indices = @transform_4, window_bounds = array<i64: 1, 256>}, {pipeline_mode = #tpu.pipeline_mode<synchronous>, transform_indices = @transform_5, window_bounds = array<i64: 1, 256>}, {pipeline_mode = #tpu.pipeline_mode<synchronous>, transform_indices = @transform_6, window_bounds = array<i64: 1, 1>}, {transform_indices = @transform_7, window_bounds = array<i64: 16, 1>}]} {
    %c0 = arith.constant 0 : index
    %c0_0 = arith.constant 0 : index
    %0 = vector.load %arg1[%c0, %c0_0] : memref<16x256xbf16, #tpu.memory_space<vmem>>, vector<16x256xbf16>
    %c0_1 = arith.constant 0 : index
    %c0_2 = arith.constant 0 : index
    %1 = vector.load %arg2[%c0_1, %c0_2] : memref<256x512xbf16, #tpu.memory_space<vmem>>, vector<256x512xbf16>
    %cst = arith.constant dense<0.000000e+00> : vector<16x512xf32>
    %2 = tpu.matmul %0, %1, %cst {dimension_numbers = #tpu.dot_dimension_numbers<[1], [0], [0], [1], [0, 0, 1, 1], [], []>} : vector<16x256xbf16>, vector<256x512xbf16>, vector<16x512xf32> -> vector<16x512xf32>
    %c0_3 = arith.constant 0 : index
    %c0_4 = arith.constant 0 : index
    %3 = vector.load %arg3[%c0_3, %c0_4] : memref<1x512xf32, #tpu.memory_space<vmem>>, vector<1x512xf32>
    %4 = vector.broadcast %3 : vector<1x512xf32> to vector<16x512xf32>
    %5 = arith.addf %2, %4 : vector<16x512xf32>
    %cst_5 = arith.constant 0.000000e+00 : f32
    %6 = vector.broadcast %cst_5 : f32 to vector<16x512xf32>
    %7 = arith.cmpf ogt, %5, %6 : vector<16x512xf32>
    %cst_6 = arith.constant 2.000000e-01 : f32
    %8 = vector.broadcast %cst_6 : f32 to vector<16x512xf32>
    %9 = arith.mulf %8, %5 : vector<16x512xf32>
    %10 = arith.select %7, %5, %9 : vector<16x512xi1>, vector<16x512xf32>
    %11 = arith.truncf %10 : vector<16x512xf32> to vector<16x512xbf16>
    %c0_7 = arith.constant 0 : index
    %c0_8 = arith.constant 0 : index
    %12 = vector.load %arg4[%c0_7, %c0_8] : memref<512x256xbf16, #tpu.memory_space<vmem>>, vector<512x256xbf16>
    %cst_9 = arith.constant dense<0.000000e+00> : vector<16x256xf32>
    %13 = tpu.matmul %11, %12, %cst_9 {dimension_numbers = #tpu.dot_dimension_numbers<[1], [0], [0], [1], [0, 0, 1, 1], [], []>} : vector<16x512xbf16>, vector<512x256xbf16>, vector<16x256xf32> -> vector<16x256xf32>
    %c0_10 = arith.constant 0 : index
    %c0_11 = arith.constant 0 : index
    %14 = vector.load %arg5[%c0_10, %c0_11] : memref<1x256xf32, #tpu.memory_space<vmem>>, vector<1x256xf32>
    %15 = vector.broadcast %14 : vector<1x256xf32> to vector<16x256xf32>
    %16 = arith.addf %13, %15 : vector<16x256xf32>
    %cst_12 = arith.constant 0.000000e+00 : f32
    %17 = vector.broadcast %cst_12 : f32 to vector<16x256xf32>
    %18 = arith.cmpf ogt, %16, %17 : vector<16x256xf32>
    %cst_13 = arith.constant 2.000000e-01 : f32
    %19 = vector.broadcast %cst_13 : f32 to vector<16x256xf32>
    %20 = arith.mulf %19, %16 : vector<16x256xf32>
    %21 = arith.select %18, %16, %20 : vector<16x256xi1>, vector<16x256xf32>
    %c0_14 = arith.constant 0 : index
    %c0_15 = arith.constant 0 : index
    %22 = vector.load %arg6[%c0_14, %c0_15] : memref<1x256xbf16, #tpu.memory_space<vmem>>, vector<1x256xbf16>
    %23 = arith.extf %22 : vector<1x256xbf16> to vector<1x256xf32>
    %24 = vector.broadcast %23 : vector<1x256xf32> to vector<16x256xf32>
    %25 = arith.mulf %21, %24 : vector<16x256xf32>
    %cst_16 = arith.constant dense<0.000000e+00> : vector<16xf32>
    %26 = vector.multi_reduction <add>, %25, %cst_16 [1] : vector<16x256xf32> to vector<16xf32>
    %27 = vector.shape_cast %26 : vector<16xf32> to vector<16x1xf32>
    %c0_17 = arith.constant 0 : index
    %c0_18 = arith.constant 0 : index
    %28 = vector.load %arg7[%c0_17, %c0_18] : memref<1x1xf32, #tpu.memory_space<vmem>>, vector<1x1xf32>
    %29 = vector.broadcast %28 : vector<1x1xf32> to vector<16x1xf32>
    %30 = arith.addf %27, %29 : vector<16x1xf32>
    %31 = arith.negf %30 : vector<16x1xf32>
    %32 = math.exp %31 : vector<16x1xf32>
    %cst_19 = arith.constant 1.000000e+00 : f32
    %33 = vector.broadcast %cst_19 : f32 to vector<16x1xf32>
    %34 = arith.addf %33, %32 : vector<16x1xf32>
    %35 = arith.divf %33, %34 : vector<16x1xf32>
    %c0_20 = arith.constant 0 : index
    %c0_21 = arith.constant 0 : index
    %36 = vector.load %arg8[%c0_20, %c0_21] : memref<16x1xf32, #tpu.memory_space<vmem>>, vector<16x1xf32>
    tpu.vector_store %arg8[%c0_20, %c0_21], %35 {strides = array<i32>} : memref<16x1xf32, #tpu.memory_space<vmem>>, vector<16x1xf32>,
    return
  }
  func.func @transform_0(%arg0: i32) -> (i32, i32) {
    %c0_i32 = arith.constant 0 : i32
    %c0_i32_0 = arith.constant 0 : i32
    return %arg0, %c0_i32 : i32, i32
  }
  func.func @transform_1(%arg0: i32) -> (i32, i32) {
    %c0_i32 = arith.constant 0 : i32
    %c0_i32_0 = arith.constant 0 : i32
    %c0_i32_1 = arith.constant 0 : i32
    return %c0_i32, %c0_i32_0 : i32, i32
  }
  func.func @transform_2(%arg0: i32) -> (i32, i32) {
    %c0_i32 = arith.constant 0 : i32
    %c0_i32_0 = arith.constant 0 : i32
    %c0_i32_1 = arith.constant 0 : i32
    return %c0_i32, %c0_i32_0 : i32, i32
  }
  func.func @transform_3(%arg0: i32) -> (i32, i32) {
    %c0_i32 = arith.constant 0 : i32
    %c0_i32_0 = arith.constant 0 : i32
    %c0_i32_1 = arith.constant 0 : i32
    return %c0_i32, %c0_i32_0 : i32, i32
  }
  func.func @transform_4(%arg0: i32) -> (i32, i32) {
    %c0_i32 = arith.constant 0 : i32
    %c0_i32_0 = arith.constant 0 : i32
    %c0_i32_1 = arith.constant 0 : i32
    return %c0_i32, %c0_i32_0 : i32, i32
  }
  func.func @transform_5(%arg0: i32) -> (i32, i32) {
    %c0_i32 = arith.constant 0 : i32
    %c0_i32_0 = arith.constant 0 : i32
    %c0_i32_1 = arith.constant 0 : i32
    return %c0_i32, %c0_i32_0 : i32, i32
  }
  func.func @transform_6(%arg0: i32) -> (i32, i32) {
    %c0_i32 = arith.constant 0 : i32
    %c0_i32_0 = arith.constant 0 : i32
    %c0_i32_1 = arith.constant 0 : i32
    return %c0_i32, %c0_i32_0 : i32, i32
  }
  func.func @transform_7(%arg0: i32) -> (i32, i32) {
    %c0_i32 = arith.constant 0 : i32
    %c0_i32_0 = arith.constant 0 : i32
    return %arg0, %c0_i32 : i32, i32
  }
}

</mosaic_0001>

<bundles_post_ra>
// kernel: tpu_custom_call.1
= control target key start
LH: loop header
LB: loop body
LE: loop exit
PB: predicated region body
PF: predicated region fallthrough
CT: control target
= control target key end

     0   :  { %s1655_s0 = inlined_call_operand.hbm [shape: bf16[16,256], index: 0, kind: input, shape index: {}]   ;;  %s1656_s1 = inlined_call_operand.hbm [shape: bf16[256,512], index: 1, kind: input, shape index: {}]   ;;  %s1657_s2 = inlined_call_operand.vmem [shape: f32[1,512], index: 2, kind: input, shape index: {}]   ;;  %s1658_s3 = inlined_call_operand.hbm [shape: bf16[512,256], index: 3, kind: input, shape index: {}]   ;;  %s1659_s4 = inlined_call_operand.vmem [shape: f32[1,256], index: 4, kind: input, shape index: {}]   ;;  %s1660_s5 = inlined_call_operand.vmem [shape: bf16[1,256], index: 5, kind: input, shape index: {}]   ;;  %s1661_s6 = inlined_call_operand.<no memory space> [shape: f32[1,1], index: 6, kind: input, shape index: {}]   ;;  %s1662_s7 = inlined_call_operand.vmem [shape: f32[16,1], index: 7, kind: output, shape index: {}]  }
   0x1   :  { %v12_v0 = vstv %s1661_s6 }
   0x2   :  { %13 = vst [vmem:[#allocation2] sm:$0x1] %v12_v0 }
   0x3   :  { %14 = vsyncpa [#allocation4], 0 }
   0x4   :  { %15 = vsyncpa [#allocation6], 0  ;;  %s1563_s26 = smov [#allocation5]  }
   0x5   :  { %s33_s27 = sshll.u32 %s1563_s26, 4  ;;  %s34_s27 = int_to_ptr.vmem [resolvable:$true] %s33_s27 }
   0x6   :  { %s1507_s28 = scalar_lea.vmem %s34_s27, 8192  ;;  %p1512_p1 = scmp.lt.s32.totalorder %s34_s27, %s34_s27 }
   0x7   :  { %p1508_p0 = scmp.ne.s32.totalorder %s34_s27, %s1507_s28  ;;  %p1513_p2 = scmp.lt.s32.totalorder %s1507_s28, %s1507_s28 }
   0x9   :  { %p1514_p3 = por %p1513_p2, %p1512_p1 }
   0xb   :  { %p1515_p4 = pnand %p1514_p3, %p1508_p0 }
   0xd   :  { %1518 = shalt.err (!%p1515_p4)
}
   0xe   :  { %s1564_s29 = smov 256   ;;  %s1565_s30 = smov 16  }
   0xf   :  { %39 = dma.hbm_to_vmem [thread:$0]  %s1656_s1, 8192, %s34_s27, [#allocation6], %s1564_s29, %s1564_s29, %s1565_s30  }
  0x10   :  { %s1566_s6 = smov [#allocation3]  }
  0x11   :  { %s21_s10 = sshll.u32 %s1566_s6, 4  ;;  %s22_s10 = int_to_ptr.vmem [resolvable:$true] %s21_s10 }
  0x12   :  { %s1527_s11 = scalar_lea.vmem %s22_s10, 256  ;;  %p1532_p6 = scmp.lt.s32.totalorder %s22_s10, %s22_s10 }
  0x13   :  { %p1528_p5 = scmp.ne.s32.totalorder %s22_s10, %s1527_s11  ;;  %p1533_p7 = scmp.lt.s32.totalorder %s1527_s11, %s1527_s11 }
  0x15   :  { %p1534_p8 = por %p1533_p7, %p1532_p6 }
  0x17   :  { %p1535_p9 = pnand %p1534_p8, %p1528_p5 }
  0x19   :  { %1538 = shalt.err (!%p1535_p9)
}
  0x1a   :  { %s1567_s12 = smov 128   ;;  %s1568_s13 = smov 8  }
  0x1b   :  { %27 = dma.hbm_to_vmem [thread:$0]  %s1655_s0, 256, %s22_s10, [#allocation4], %s1567_s12, %s1567_s12, %s1568_s13  }
  0x1c   :  { %s1569_s16 = smov [#allocation7]  }
  0x1d   :  { %s47_s17 = sshll.u32 %s1569_s16, 4  ;;  %s48_s17 = int_to_ptr.vmem [resolvable:$true] %s47_s17 }
  0x1e   :  { %s1547_s1 = scalar_lea.vmem %s48_s17, 8192  ;;  %p1552_p11 = scmp.lt.s32.totalorder %s48_s17, %s48_s17 }
  0x1f   :  { %p1548_p10 = scmp.ne.s32.totalorder %s48_s17, %s1547_s1  ;;  %p1553_p12 = scmp.lt.s32.totalorder %s1547_s1, %s1547_s1 }
  0x21   :  { %p1554_p13 = por %p1553_p12, %p1552_p11 }
  0x23   :  { %p1555_p0 = pnand %p1554_p13, %p1548_p10 }
  0x25   :  { %1558 = shalt.err (!%p1555_p0)
}
  0x26   :  { %53 = dma.hbm_to_vmem [thread:$0]  %s1658_s3, 8192, %s48_s17, [#allocation6], %s1567_s12, %s1567_s12, %s1568_s13  }
  0x27   :  { %1559 = dma.done.wait [#allocation4], 256  }
  0x28   :  { %1560 = vsyncadd [#allocation4], 4294967040 }
  0x29   :  { %1561 = dma.done.wait [#allocation6], 16384  }
  0x2a   :  { %1562 = vsyncadd [#allocation6], 4294950912  ;;  %v1296_v1 = vld [vmem:[#allocation5 + $0xe4] ss:$16 sps:$4 sm:$0xff]   ;;  %v1298_v2 = vld [vmem:[#allocation5 + $0xec] ss:$16 sps:$4 sm:$0xff]  }
  0x2b   :  { %487 = vmatprep.subr.bf16.mxu0 %v1296_v1  ;;  %v1300_v3 = vld [vmem:[#allocation5 + $0xe0] ss:$16 sps:$4 sm:$0xff]   ;;  %v1301_v4 = vld [vmem:[#allocation5 + $0xe8] ss:$16 sps:$4 sm:$0xff]   ;;  %530 = vmatprep.subr.bf16.mxu1 %v1298_v2  ;;  %v1302_v5 = vld [vmem:[#allocation5 + $0xc4] ss:$16 sps:$4 sm:$0xff]  }
  0x2c   :  { %488 = vmatpush1.bf16.msra.mxu0 %v1300_v3  ;;  %531 = vmatpush1.bf16.msra.mxu1 %v1301_v4  ;;  %v1304_v6 = vld [vmem:[#allocation5 + $0xcc] ss:$16 sps:$4 sm:$0xff]   ;;  %v1306_v7 = vld [vmem:[#allocation5 + $0xc0] ss:$16 sps:$4 sm:$0xff]   ;;  %v1307_v8 = vld [vmem:[#allocation5 + $0xc8] ss:$16 sps:$4 sm:$0xff]  }
  0x2d   :  { %489 = vmatprep.subr.bf16.mxu0 %v1302_v5  ;;  %532 = vmatprep.subr.bf16.mxu1 %v1304_v6  ;;  %v1308_v9 = vld [vmem:[#allocation5 + $0xa4] ss:$16 sps:$4 sm:$0xff]   ;;  %v1310_v10 = vld [vmem:[#allocation5 + $0xac] ss:$16 sps:$4 sm:$0xff]   ;;  %v1312_v11 = vld [vmem:[#allocation5 + $0xa0] ss:$16 sps:$4 sm:$0xff]  }
  0x2e   :  { %v1313_v12 = vld [vmem:[#allocation5 + $0xa8] ss:$16 sps:$4 sm:$0xff]   ;;  %v1314_v13 = vld [vmem:[#allocation5 + $0x84] ss:$16 sps:$4 sm:$0xff]   ;;  %v1316_v14 = vld [vmem:[#allocation5 + $0x8c] ss:$16 sps:$4 sm:$0xff]  }
  0x2f   :  { %v1318_v15 = vld [vmem:[#allocation5 + $0x80] ss:$16 sps:$4 sm:$0xff]   ;;  %v1319_v16 = vld [vmem:[#allocation5 + $0x88] ss:$16 sps:$4 sm:$0xff]   ;;  %v1320_v17 = vld [vmem:[#allocation5 + $0x64] ss:$16 sps:$4 sm:$0xff]  }
  0x30   :  { %490 = vmatpush1.bf16.msra.mxu0 %v1306_v7  ;;  %533 = vmatpush1.bf16.msra.mxu1 %v1307_v8  ;;  %v1322_v18 = vld [vmem:[#allocation5 + $0x6c] ss:$16 sps:$4 sm:$0xff]   ;;  %v1324_v19 = vld [vmem:[#allocation5 + $0x60] ss:$16 sps:$4 sm:$0xff]   ;;  %v1325_v20 = vld [vmem:[#allocation5 + $0x68] ss:$16 sps:$4 sm:$0xff]  }
  0x31   :  { %491 = vmatprep.subr.bf16.mxu0 %v1308_v9  ;;  %534 = vmatprep.subr.bf16.mxu1 %v1310_v10  ;;  %v1326_v21 = vld [vmem:[#allocation5 + $0x44] ss:$16 sps:$4 sm:$0xff]   ;;  %v1328_v22 = vld [vmem:[#allocation5 + $0x4c] ss:$16 sps:$4 sm:$0xff]   ;;  %v1330_v23 = vld [vmem:[#allocation5 + $0x40] ss:$16 sps:$4 sm:$0xff]  }
  0x32   :  { %v1331_v24 = vld [vmem:[#allocation5 + $0x48] ss:$16 sps:$4 sm:$0xff]   ;;  %v1332_v25 = vld [vmem:[#allocation5 + $0x24] ss:$16 sps:$4 sm:$0xff]   ;;  %v1334_v26 = vld [vmem:[#allocation5 + $0x2c] ss:$16 sps:$4 sm:$0xff]  }
  0x33   :  { %v1336_v27 = vld [vmem:[#allocation5 + $0x20] ss:$16 sps:$4 sm:$0xff]   ;;  %v1337_v28 = vld [vmem:[#allocation5 + $0x28] ss:$16 sps:$4 sm:$0xff]   ;;  %v1338_v29 = vld [vmem:[#allocation5 + $0x4] ss:$16 sps:$4 sm:$0xff]  }
  0x34   :  { %492 = vmatpush1.bf16.msra.mxu0 %v1312_v11  ;;  %535 = vmatpush1.bf16.msra.mxu1 %v1313_v12  ;;  %v1340_v30 = vld [vmem:[#allocation5 + $0xc] ss:$16 sps:$4 sm:$0xff]   ;;  %v1342_v31 = vld [vmem:[#allocation5] ss:$16 sps:$4 sm:$0xff]   ;;  %v1343_v32 = vld [vmem:[#allocation5 + $0x8] ss:$16 sps:$4 sm:$0xff]  }
  0x35   :  { %493 = vmatprep.subr.bf16.mxu0 %v1314_v13  ;;  %536 = vmatprep.subr.bf16.mxu1 %v1316_v14  ;;  %v1344_v33 = vld [vmem:[#allocation5 + $0x1e4] ss:$16 sps:$4 sm:$0xff]   ;;  %v1346_v34 = vld [vmem:[#allocation5 + $0x1ec] ss:$16 sps:$4 sm:$0xff]   ;;  %v1348_v35 = vld [vmem:[#allocation5 + $0x1e0] ss:$16 sps:$4 sm:$0xff]  }
  0x36   :  { %v1349_v36 = vld [vmem:[#allocation5 + $0x1e8] ss:$16 sps:$4 sm:$0xff]   ;;  %v1350_v37 = vld [vmem:[#allocation5 + $0x1c4] ss:$16 sps:$4 sm:$0xff]   ;;  %v1352_v38 = vld [vmem:[#allocation5 + $0x1cc] ss:$16 sps:$4 sm:$0xff]  }
  0x37   :  { %v1354_v39 = vld [vmem:[#allocation5 + $0x1c0] ss:$16 sps:$4 sm:$0xff]   ;;  %v1355_v40 = vld [vmem:[#allocation5 + $0x1c8] ss:$16 sps:$4 sm:$0xff]   ;;  %v1356_v41 = vld [vmem:[#allocation5 + $0x1a4] ss:$16 sps:$4 sm:$0xff]  }
  0x38   :  { %494 = vmatpush1.bf16.msra.mxu0 %v1318_v15  ;;  %537 = vmatpush1.bf16.msra.mxu1 %v1319_v16  ;;  %v1358_v42 = vld [vmem:[#allocation5 + $0x1ac] ss:$16 sps:$4 sm:$0xff]   ;;  %v1360_v43 = vld [vmem:[#allocation5 + $0x1a0] ss:$16 sps:$4 sm:$0xff]   ;;  %v1361_v44 = vld [vmem:[#allocation5 + $0x1a8] ss:$16 sps:$4 sm:$0xff]  }
  0x39   :  { %495 = vmatprep.subr.bf16.mxu0 %v1320_v17  ;;  %538 = vmatprep.subr.bf16.mxu1 %v1322_v18  ;;  %v1362_v45 = vld [vmem:[#allocation5 + $0x184] ss:$16 sps:$4 sm:$0xff]   ;;  %v1364_v46 = vld [vmem:[#allocation5 + $0x18c] ss:$16 sps:$4 sm:$0xff]   ;;  %v1366_v47 = vld [vmem:[#allocation5 + $0x180] ss:$16 sps:$4 sm:$0xff]  }
  0x3a   :  { %v1367_v48 = vld [vmem:[#allocation5 + $0x188] ss:$16 sps:$4 sm:$0xff]   ;;  %v1394_v49 = vld [vmem:[#allocation3 + $0x4] ss:$8 sps:$4 sm:$0xff]   ;;  %v1372_v52 = vld [vmem:[#allocation5 + $0x160] ss:$16 sps:$4 sm:$0xff]  }
  0x3b   :  { %v1368_v50 = vld [vmem:[#allocation5 + $0x164] ss:$16 sps:$4 sm:$0xff]   ;;  %v1370_v51 = vld [vmem:[#allocation5 + $0x16c] ss:$16 sps:$4 sm:$0xff]   ;;  %519 = vmatprep.mubr.bf16.mxu0 %v1394_v49  ;;  %562 = vmatprep.mubr.bf16.mxu1 %v1394_v49  ;;  %v1373_v53 = vld [vmem:[#allocation5 + $0x168] ss:$16 sps:$4 sm:$0xff]  }
  0x3c   :  { %496 = vmatpush1.bf16.msra.mxu0 %v1324_v19  ;;  %539 = vmatpush1.bf16.msra.mxu1 %v1325_v20  ;;  %v1374_v54 = vld [vmem:[#allocation5 + $0x144] ss:$16 sps:$4 sm:$0xff]   ;;  %v1376_v55 = vld [vmem:[#allocation5 + $0x14c] ss:$16 sps:$4 sm:$0xff]   ;;  %v1378_v56 = vld [vmem:[#allocation5 + $0x140] ss:$16 sps:$4 sm:$0xff]  }
  0x3d   :  { %497 = vmatprep.subr.bf16.mxu0 %v1326_v21  ;;  %540 = vmatprep.subr.bf16.mxu1 %v1328_v22  ;;  %v1379_v57 = vld [vmem:[#allocation5 + $0x148] ss:$16 sps:$4 sm:$0xff]   ;;  %v1380_v58 = vld [vmem:[#allocation5 + $0x124] ss:$16 sps:$4 sm:$0xff]   ;;  %v1382_v59 = vld [vmem:[#allocation5 + $0x12c] ss:$16 sps:$4 sm:$0xff]  }
  0x3e   :  { %v1384_v60 = vld [vmem:[#allocation5 + $0x120] ss:$16 sps:$4 sm:$0xff]   ;;  %v1385_v61 = vld [vmem:[#allocation5 + $0x128] ss:$16 sps:$4 sm:$0xff]   ;;  %v1386_v62 = vld [vmem:[#allocation5 + $0x104] ss:$16 sps:$4 sm:$0xff]  }
  0x3f   :  { %v1388_v63 = vld [vmem:[#allocation5 + $0x10c] ss:$16 sps:$4 sm:$0xff]   ;;  %v1390_v0 = vld [vmem:[#allocation5 + $0x100] ss:$16 sps:$4 sm:$0xff]   ;;  %v1391_v1 = vld [vmem:[#allocation5 + $0x108] ss:$16 sps:$4 sm:$0xff]  }
  0x40   :  { %498 = vmatpush1.bf16.msra.mxu0 %v1330_v23  ;;  %541 = vmatpush1.bf16.msra.mxu1 %v1331_v24  ;;  %v1397_v2 = vld [vmem:[#allocation7 + $0x74] ss:$8 sps:$4 sm:$0xff]   ;;  %v1392_v4 = vld [vmem:[#allocation3] ss:$8 sps:$4 sm:$0xff]   ;;  %v1403_v7 = vld [vmem:[#allocation7 + $0x64] ss:$8 sps:$4 sm:$0xff]  }
  0x41   :  { %499 = vmatprep.subr.bf16.mxu0 %v1332_v25  ;;  %542 = vmatprep.subr.bf16.mxu1 %v1334_v26  ;;  %v1400_v3 = vld [vmem:[#allocation7 + $0x174] ss:$8 sps:$4 sm:$0xff]   ;;  %v1395_v5 = vld [vmem:[#allocation7 + $0x70] ss:$8 sps:$4 sm:$0xff]   ;;  %v1406_v8 = vld [vmem:[#allocation7 + $0x164] ss:$8 sps:$4 sm:$0xff]  }
  0x42   :  { %v1398_v6 = vld [vmem:[#allocation7 + $0x170] ss:$8 sps:$4 sm:$0xff]   ;;  %v1401_v9 = vld [vmem:[#allocation7 + $0x60] ss:$8 sps:$4 sm:$0xff]   ;;  %v1409_v11 = vld [vmem:[#allocation7 + $0x54] ss:$8 sps:$4 sm:$0xff]  }
  0x43   :  { %v1404_v10 = vld [vmem:[#allocation7 + $0x160] ss:$8 sps:$4 sm:$0xff]   ;;  %v1412_v12 = vld [vmem:[#allocation7 + $0x154] ss:$8 sps:$4 sm:$0xff]   ;;  %v1407_v13 = vld [vmem:[#allocation7 + $0x50] ss:$8 sps:$4 sm:$0xff]  }
  0x44   :  { %500 = vmatpush1.bf16.msra.mxu0 %v1336_v27  ;;  %543 = vmatpush1.bf16.msra.mxu1 %v1337_v28  ;;  %v1410_v14 = vld [vmem:[#allocation7 + $0x150] ss:$8 sps:$4 sm:$0xff]   ;;  %v1415_v15 = vld [vmem:[#allocation7 + $0x44] ss:$8 sps:$4 sm:$0xff]   ;;  %v1413_v17 = vld [vmem:[#allocation7 + $0x40] ss:$8 sps:$4 sm:$0xff]  }
  0x45   :  { %501 = vmatprep.subr.bf16.mxu0 %v1338_v29  ;;  %544 = vmatprep.subr.bf16.mxu1 %v1340_v30  ;;  %v1418_v16 = vld [vmem:[#allocation7 + $0x144] ss:$8 sps:$4 sm:$0xff]   ;;  %v1416_v18 = vld [vmem:[#allocation7 + $0x140] ss:$8 sps:$4 sm:$0xff]   ;;  %v1421_v19 = vld [vmem:[#allocation7 + $0x34] ss:$8 sps:$4 sm:$0xff]  }
  0x46   :  { %v1424_v20 = vld [vmem:[#allocation7 + $0x134] ss:$8 sps:$4 sm:$0xff]   ;;  %v1419_v21 = vld [vmem:[#allocation7 + $0x30] ss:$8 sps:$4 sm:$0xff]   ;;  %v1427_v23 = vld [vmem:[#allocation7 + $0x24] ss:$8 sps:$4 sm:$0xff]  }
  0x47   :  { %v1422_v22 = vld [vmem:[#allocation7 + $0x130] ss:$8 sps:$4 sm:$0xff]   ;;  %v1430_v24 = vld [vmem:[#allocation7 + $0x124] ss:$8 sps:$4 sm:$0xff]   ;;  %v1425_v25 = vld [vmem:[#allocation7 + $0x20] ss:$8 sps:$4 sm:$0xff]  }
  0x48   :  { %502 = vmatpush1.bf16.msra.mxu0 %v1342_v31  ;;  %545 = vmatpush1.bf16.msra.mxu1 %v1343_v32  ;;  %v1428_v26 = vld [vmem:[#allocation7 + $0x120] ss:$8 sps:$4 sm:$0xff]   ;;  %v1433_v27 = vld [vmem:[#allocation7 + $0x14] ss:$8 sps:$4 sm:$0xff]   ;;  %v1431_v29 = vld [vmem:[#allocation7 + $0x10] ss:$8 sps:$4 sm:$0xff]  }
  0x49   :  { %503 = vmatprep.subr.bf16.mxu0 %v1344_v33  ;;  %546 = vmatprep.subr.bf16.mxu1 %v1346_v34  ;;  %v1436_v28 = vld [vmem:[#allocation7 + $0x114] ss:$8 sps:$4 sm:$0xff]   ;;  %v1434_v30 = vld [vmem:[#allocation7 + $0x110] ss:$8 sps:$4 sm:$0xff]   ;;  %v1439_v31 = vld [vmem:[#allocation7 + $0x4] ss:$8 sps:$4 sm:$0xff]  }
  0x4a   :  { %v1442_v32 = vld [vmem:[#allocation7 + $0x104] ss:$8 sps:$4 sm:$0xff]   ;;  %v1437_v33 = vld [vmem:[#allocation7] ss:$8 sps:$4 sm:$0xff]   ;;  %vm1147_vm12 = vcmask 7168  }
  0x4b   :  { %v1440_v34 = vld [vmem:[#allocation7 + $0x100] ss:$8 sps:$4 sm:$0xff]  }
  0x4c   :  { %504 = vmatpush2.bf16.msra.mxu0 %v1348_v35  ;;  %547 = vmatpush2.bf16.msra.mxu1 %v1349_v36  ;;  %v1445_v35 = vld [vmem:[#allocation7 + $0xf4] ss:$8 sps:$4 sm:$0xff]   ;;  %v1461_v49 = vld [vmem:[#allocation7 + $0xc0] ss:$8 sps:$4 sm:$0xff]  }
  0x4d   :  { %505 = vmatprep.subr.bf16.mxu0 %v1350_v37  ;;  %548 = vmatprep.subr.bf16.mxu1 %v1352_v38  ;;  %v1448_v36 = vld [vmem:[#allocation7 + $0x1f4] ss:$8 sps:$4 sm:$0xff]   ;;  %v1443_v37 = vld [vmem:[#allocation7 + $0xf0] ss:$8 sps:$4 sm:$0xff]  }
  0x4e   :  { %v1446_v38 = vld [vmem:[#allocation7 + $0x1f0] ss:$8 sps:$4 sm:$0xff]  }
  0x50   :  { %506 = vmatpush2.bf16.msra.mxu0 %v1354_v39  ;;  %549 = vmatpush2.bf16.msra.mxu1 %v1355_v40  ;;  %v1451_v39 = vld [vmem:[#allocation7 + $0xe4] ss:$8 sps:$4 sm:$0xff]  }
  0x51   :  { %507 = vmatprep.subr.bf16.mxu0 %v1356_v41  ;;  %550 = vmatprep.subr.bf16.mxu1 %v1358_v42  ;;  %v1454_v40 = vld [vmem:[#allocation7 + $0x1e4] ss:$8 sps:$4 sm:$0xff]   ;;  %v1449_v41 = vld [vmem:[#allocation7 + $0xe0] ss:$8 sps:$4 sm:$0xff]  }
  0x52   :  { %v1452_v42 = vld [vmem:[#allocation7 + $0x1e0] ss:$8 sps:$4 sm:$0xff]  }
  0x54   :  { %508 = vmatpush2.bf16.msra.mxu0 %v1360_v43  ;;  %551 = vmatpush2.bf16.msra.mxu1 %v1361_v44  ;;  %v1457_v43 = vld [vmem:[#allocation7 + $0xd4] ss:$8 sps:$4 sm:$0xff]  }
  0x55   :  { %509 = vmatprep.subr.bf16.mxu0 %v1362_v45  ;;  %552 = vmatprep.subr.bf16.mxu1 %v1364_v46  ;;  %v1460_v44 = vld [vmem:[#allocation7 + $0x1d4] ss:$8 sps:$4 sm:$0xff]   ;;  %v1455_v45 = vld [vmem:[#allocation7 + $0xd0] ss:$8 sps:$4 sm:$0xff]  }
  0x56   :  { %v1458_v46 = vld [vmem:[#allocation7 + $0x1d0] ss:$8 sps:$4 sm:$0xff]  }
  0x58   :  { %510 = vmatpush2.bf16.msra.mxu0 %v1366_v47  ;;  %553 = vmatpush2.bf16.msra.mxu1 %v1367_v48  ;;  %v1463_v47 = vld [vmem:[#allocation7 + $0xc4] ss:$8 sps:$4 sm:$0xff]  }
  0x59   :  { %511 = vmatprep.subr.bf16.mxu0 %v1368_v50  ;;  %554 = vmatprep.subr.bf16.mxu1 %v1370_v51  ;;  %v1466_v48 = vld [vmem:[#allocation7 + $0x1c4] ss:$8 sps:$4 sm:$0xff]   ;;  %v1464_v50 = vld [vmem:[#allocation7 + $0x1c0] ss:$8 sps:$4 sm:$0xff]   ;;  %v1469_v51 = vld [vmem:[#allocation7 + $0xb4] ss:$8 sps:$4 sm:$0xff]  }
  0x5c   :  { %512 = vmatpush2.bf16.msra.mxu0 %v1372_v52  ;;  %555 = vmatpush2.bf16.msra.mxu1 %v1373_v53  ;;  %v1472_v52 = vld [vmem:[#allocation7 + $0x1b4] ss:$8 sps:$4 sm:$0xff]   ;;  %v1467_v53 = vld [vmem:[#allocation7 + $0xb0] ss:$8 sps:$4 sm:$0xff]  }
  0x5d   :  { %513 = vmatprep.subr.bf16.mxu0 %v1374_v54  ;;  %556 = vmatprep.subr.bf16.mxu1 %v1376_v55  ;;  %v1470_v54 = vld [vmem:[#allocation7 + $0x1b0] ss:$8 sps:$4 sm:$0xff]   ;;  %v1475_v55 = vld [vmem:[#allocation7 + $0xa4] ss:$8 sps:$4 sm:$0xff]  }
  0x60   :  { %514 = vmatpush2.bf16.msra.mxu0 %v1378_v56  ;;  %557 = vmatpush2.bf16.msra.mxu1 %v1379_v57  ;;  %v1478_v56 = vld [vmem:[#allocation7 + $0x1a4] ss:$8 sps:$4 sm:$0xff]   ;;  %v1473_v57 = vld [vmem:[#allocation7 + $0xa0] ss:$8 sps:$4 sm:$0xff]  }
  0x61   :  { %515 = vmatprep.subr.bf16.mxu0 %v1380_v58  ;;  %558 = vmatprep.subr.bf16.mxu1 %v1382_v59  ;;  %v1476_v58 = vld [vmem:[#allocation7 + $0x1a0] ss:$8 sps:$4 sm:$0xff]   ;;  %v1481_v59 = vld [vmem:[#allocation7 + $0x94] ss:$8 sps:$4 sm:$0xff]  }
  0x64   :  { %516 = vmatpush2.bf16.msra.mxu0 %v1384_v60  ;;  %559 = vmatpush2.bf16.msra.mxu1 %v1385_v61  ;;  %v1484_v60 = vld [vmem:[#allocation7 + $0x194] ss:$8 sps:$4 sm:$0xff]   ;;  %v1479_v61 = vld [vmem:[#allocation7 + $0x90] ss:$8 sps:$4 sm:$0xff]  }
  0x65   :  { %517 = vmatprep.subr.bf16.mxu0 %v1386_v62  ;;  %560 = vmatprep.subr.bf16.mxu1 %v1388_v63  ;;  %v1482_v62 = vld [vmem:[#allocation7 + $0x190] ss:$8 sps:$4 sm:$0xff]   ;;  %v1485_v63 = vld [vmem:[#allocation7 + $0x80] ss:$8 sps:$4 sm:$0xff]  }
  0x68   :  { %518 = vmatpush2.bf16.msra.mxu0 %v1390_v0  ;;  %561 = vmatpush2.bf16.msra.mxu1 %v1391_v1  ;;  %v1487_v0 = vld [vmem:[#allocation7 + $0x84] ss:$8 sps:$4 sm:$0xff]   ;;  %v1488_v1 = vld [vmem:[#allocation7 + $0x180] ss:$8 sps:$4 sm:$0xff]  }
  0x69   :  { %997 = vmatprep.subr.bf16.mxu0 %v1397_v2  ;;  %1040 = vmatprep.subr.bf16.mxu1 %v1400_v3  ;;  %v1490_v2 = vld [vmem:[#allocation7 + $0x184] ss:$8 sps:$4 sm:$0xff]   ;;  %v137_v3 = vlaneseq }
  0x6b   :  { %520 = vmatmul.mubr.bf16.vlgmr.msra.gmra.mxu0 %v1392_v4  ;;  %563 = vmatmul.mubr.bf16.vlgmr.msra.gmra.mxu1 %v1392_v4  ;;  %v1622_v4 = vshrl.u32 %v137_v3, 7 }
  0x6c   :  { %998 = vmatpush1.bf16.msra.mxu0 %v1395_v5  ;;  %1041 = vmatpush1.bf16.msra.mxu1 %v1398_v6  ;;  %v135_v6 = vld [vmem:[%s1657_s2] sm:$0xf] }
  0x6d   :  { %999 = vmatprep.subr.bf16.mxu0 %v1403_v7  ;;  %1042 = vmatprep.subr.bf16.mxu1 %v1406_v8  ;;  %v1625_v5 = vsub.s32 0, %v1622_v4  ;;  %v143_v7 = vsub.s32 1, %v1622_v4  ;;  %v151_v8 = vsub.s32 3, %v1622_v4 }
  0x70   :  { %1000 = vmatpush1.bf16.msra.mxu0 %v1401_v9  ;;  %1043 = vmatpush1.bf16.msra.mxu1 %v1404_v10  ;;  %v147_v9 = vsub.s32 2, %v1622_v4  ;;  %v140_v10 = vrot.slane %v135_v6, %v1625_v5 }
  0x71   :  { %1001 = vmatprep.subr.bf16.mxu0 %v1409_v11  ;;  %1044 = vmatprep.subr.bf16.mxu1 %v1412_v12 }
  0x74   :  { %1002 = vmatpush1.bf16.msra.mxu0 %v1407_v13  ;;  %1045 = vmatpush1.bf16.msra.mxu1 %v1410_v14  ;;  %v144_v13 = vrot.slane %v135_v6, %v143_v7  ;;  %v152_v14 = vrot.slane %v135_v6, %v151_v8 }
  0x75   :  { %1003 = vmatprep.subr.bf16.mxu0 %v1415_v15  ;;  %1046 = vmatprep.subr.bf16.mxu1 %v1418_v16  ;;  %v148_v15 = vrot.slane %v135_v6, %v147_v9 }
  0x78   :  { %1004 = vmatpush1.bf16.msra.mxu0 %v1413_v17  ;;  %1047 = vmatpush1.bf16.msra.mxu1 %v1416_v18 }
  0x79   :  { %1005 = vmatprep.subr.bf16.mxu0 %v1421_v19  ;;  %1048 = vmatprep.subr.bf16.mxu1 %v1424_v20 }
  0x7c   :  { %1006 = vmatpush1.bf16.msra.mxu0 %v1419_v21  ;;  %1049 = vmatpush1.bf16.msra.mxu1 %v1422_v22 }
  0x7d   :  { %1007 = vmatprep.subr.bf16.mxu0 %v1427_v23  ;;  %1050 = vmatprep.subr.bf16.mxu1 %v1430_v24 }
  0x80   :  { %1008 = vmatpush1.bf16.msra.mxu0 %v1425_v25  ;;  %1051 = vmatpush1.bf16.msra.mxu1 %v1428_v26 }
  0x81   :  { %1009 = vmatprep.subr.bf16.mxu0 %v1433_v27  ;;  %1052 = vmatprep.subr.bf16.mxu1 %v1436_v28 }
  0x84   :  { %1010 = vmatpush1.bf16.msra.mxu0 %v1431_v29  ;;  %1053 = vmatpush1.bf16.msra.mxu1 %v1434_v30 }
  0x85   :  { %1011 = vmatprep.subr.bf16.mxu0 %v1439_v31  ;;  %1054 = vmatprep.subr.bf16.mxu1 %v1442_v32 }
  0x88   :  { %1012 = vmatpush1.bf16.msra.mxu0 %v1437_v33  ;;  %1055 = vmatpush1.bf16.msra.mxu1 %v1440_v34 }
  0x89   :  { %1013 = vmatprep.subr.bf16.mxu0 %v1445_v35  ;;  %1056 = vmatprep.subr.bf16.mxu1 %v1448_v36 }
  0x8c   :  { %1014 = vmatpush2.bf16.msra.mxu0 %v1443_v37  ;;  %1057 = vmatpush2.bf16.msra.mxu1 %v1446_v38 }
  0x8d   :  { %1015 = vmatprep.subr.bf16.mxu0 %v1451_v39  ;;  %1058 = vmatprep.subr.bf16.mxu1 %v1454_v40 }
  0x90   :  { %1016 = vmatpush2.bf16.msra.mxu0 %v1449_v41  ;;  %1059 = vmatpush2.bf16.msra.mxu1 %v1452_v42 }
  0x91   :  { %1017 = vmatprep.subr.bf16.mxu0 %v1457_v43  ;;  %1060 = vmatprep.subr.bf16.mxu1 %v1460_v44 }
  0x94   :  { %1018 = vmatpush2.bf16.msra.mxu0 %v1455_v45  ;;  %1061 = vmatpush2.bf16.msra.mxu1 %v1458_v46 }
  0x95   :  { %1019 = vmatprep.subr.bf16.mxu0 %v1463_v47  ;;  %1062 = vmatprep.subr.bf16.mxu1 %v1466_v48 }
  0x98   :  { %1020 = vmatpush2.bf16.msra.mxu0 %v1461_v49  ;;  %1063 = vmatpush2.bf16.msra.mxu1 %v1464_v50  ;;  %v665_v50 = vld [vmem:[%s1659_s4] sm:$0x3] }
  0x99   :  { %1021 = vmatprep.subr.bf16.mxu0 %v1469_v51  ;;  %1064 = vmatprep.subr.bf16.mxu1 %v1472_v52  ;;  %v1095_v51 = vld [vmem:[%s1660_s5] sm:$0x3]  ;;  %v670_v52 = vrot.slane %v665_v50, %v1625_v5 }
  0x9c   :  { %1022 = vmatpush2.bf16.msra.mxu0 %v1467_v53  ;;  %1065 = vmatpush2.bf16.msra.mxu1 %v1470_v54  ;;  %v1096_v53 = vunpack.c.l.bf16 %v1095_v51  ;;  %v674_v54 = vrot.slane %v665_v50, %v143_v7 }
  0x9d   :  { %1023 = vmatprep.subr.bf16.mxu0 %v1475_v55  ;;  %1066 = vmatprep.subr.bf16.mxu1 %v1478_v56 }
  0xa0   :  { %1024 = vmatpush2.bf16.msra.mxu0 %v1473_v57  ;;  %1067 = vmatpush2.bf16.msra.mxu1 %v1476_v58 }
  0xa1   :  { %1025 = vmatprep.subr.bf16.mxu0 %v1481_v59  ;;  %1068 = vmatprep.subr.bf16.mxu1 %v1484_v60  ;;  %v1101_v59 = vrot.slane %v1096_v53, %v1625_v5  ;;  %v1105_v60 = vrot.slane %v1096_v53, %v147_v9 }
  0xa3   :  { %v1111_v7 = vrot.slane %v1101_v59, %v1625_v5 }
  0xa4   :  { %1026 = vmatpush2.bf16.msra.mxu0 %v1479_v61  ;;  %1069 = vmatpush2.bf16.msra.mxu1 %v1482_v62 }
  0xa5   :  { %1027 = vmatprep.subr.bf16.mxu0 %v1487_v0  ;;  %1070 = vmatprep.subr.bf16.mxu1 %v1490_v2 }
  0xa8   :  { %1028 = vmatpush2.bf16.msra.mxu0 %v1485_v63  ;;  %1071 = vmatpush2.bf16.msra.mxu1 %v1488_v1 }
 0x12b   :  { %v521_v11 = vpop.f32.mrf.mxu0  ;;  %v564_v12 = vpop.f32.mrf.mxu1 }
 0x12c   :  { %v522_v18 = vadd.f32 %v521_v11, %v140_v10  ;;  %v565_v25 = vadd.f32 %v564_v12, %v148_v15 }
 0x12d   :  { %v523_v16 = vpop.f32.mrf.mxu0  ;;  %v566_v17 = vpop.f32.mrf.mxu1 }
 0x12e   :  { %v524_v19 = vadd.f32 %v523_v16, %v144_v13  ;;  %v567_v22 = vadd.f32 %v566_v17, %v152_v14  ;;  %vm573_vm0 = vcmp.gt.f32.partialorder %v522_v18, 0.0  ;;  %v581_v33 = vmul.f32 0.2, %v522_v18 }
 0x12f   :  { %v525_v20 = vpop.f32.mrf.mxu0  ;;  %v568_v21 = vpop.f32.mrf.mxu1  ;;  %v583_v35 = vmul.f32 0.2, %v565_v25  ;;  %vm575_vm6 = vcmp.gt.f32.partialorder %v565_v25, 0.0 }
 0x130   :  { %v526_v23 = vadd.f32 %v525_v20, %v140_v10  ;;  %v569_v24 = vadd.f32 %v568_v21, %v148_v15  ;;  %v582_v28 = vmul.f32 0.2, %v524_v19  ;;  %vm574_vm2 = vcmp.gt.f32.partialorder %v524_v19, 0.0 }
 0x131   :  { %v527_v26 = vpop.f32.mrf.mxu0  ;;  %v570_v27 = vpop.f32.mrf.mxu1  ;;  %v584_v34 = vmul.f32 0.2, %v567_v22  ;;  %vm576_vm4 = vcmp.gt.f32.partialorder %v567_v22, 0.0  ;;  %v589_v42 = vsel %vm573_vm0, %v522_v18, %v581_v33  ;;  %v591_v46 = vsel %vm575_vm6, %v565_v25, %v583_v35  ;;  %v1286_v25 = vld [vmem:[#allocation2] ss:$0 sm:$0xff] }
 0x132   :  { %v585_v29 = vmul.f32 0.2, %v526_v23  ;;  %vm577_vm1 = vcmp.gt.f32.partialorder %v526_v23, 0.0  ;;  %v587_v30 = vmul.f32 0.2, %v569_v24  ;;  %v528_v31 = vadd.f32 %v527_v26, %v144_v13 }
 0x133   :  { %v571_v32 = vadd.f32 %v570_v27, %v152_v14  ;;  %vm579_vm3 = vcmp.gt.f32.partialorder %v569_v24, 0.0  ;;  %v590_v40 = vsel %vm574_vm2, %v524_v19, %v582_v28  ;;  %v592_v44 = vsel %vm576_vm4, %v567_v22, %v584_v34 }
 0x134   :  { %vm578_vm5 = vcmp.gt.f32.partialorder %v528_v31, 0.0  ;;  %v586_v36 = vmul.f32 0.2, %v528_v31  ;;  %v593_v37 = vsel %vm577_vm1, %v526_v23, %v585_v29  ;;  %v595_v39 = vsel %vm579_vm3, %v569_v24, %v587_v30 }
 0x135   :  { %vm580_vm7 = vcmp.gt.f32.partialorder %v571_v32, 0.0  ;;  %v588_v38 = vmul.f32 0.2, %v571_v32  ;;  %v597_v47 = vpack.c.bf16 %v593_v37, %v589_v42  ;;  %v599_v49 = vpack.c.bf16 %v595_v39, %v591_v46 }
 0x136   :  { %v594_v41 = vsel %vm578_vm5, %v528_v31, %v586_v36  ;;  %v1115_v10 = vrot.slane %v1105_v60, %v1625_v5 }
 0x137   :  { %v598_v43 = vpack.c.bf16 %v594_v41, %v590_v40  ;;  %v596_v45 = vsel %vm580_vm7, %v571_v32, %v588_v38 }
 0x138   :  { %v600_v48 = vpack.c.bf16 %v596_v45, %v592_v44 }
 0x139   :  { %1029 = vmatprep.mubr.bf16.mxu0 %v598_v43 }
 0x13a   :  { %1072 = vmatprep.mubr.bf16.mxu1 %v600_v48  ;;  %1030 = vmatmul.mubr.bf16.vlgmr.msra.gmra.mxu0 %v597_v47 }
 0x13b   :  { %1073 = vmatmul.mubr.bf16.vlgmr.msra.gmra.mxu1 %v599_v49 }
 0x1fa   :  { %v1031_v55 = vpop.f32.mrf.mxu0 }
 0x1fb   :  { %v1032_v56 = vadd.f32 %v1031_v55, %v670_v52  ;;  %v1074_v57 = vpop.f32.mrf.mxu1 }
 0x1fc   :  { %v1033_v58 = vpop.f32.mrf.mxu0 }
 0x1fd   :  { %v1075_v61 = vadd.f32 %v1074_v57, %v1032_v56  ;;  %v1034_v62 = vadd.f32 %v1033_v58, %v674_v54  ;;  %v1076_v63 = vpop.f32.mrf.mxu1 }
 0x1fe   :  { %v1035_v0 = vpop.f32.mrf.mxu0 }
 0x1ff   :  { %vm1083_vm8 = vcmp.gt.f32.partialorder %v1075_v61, 0.0  ;;  %v1087_v1 = vmul.f32 0.2, %v1075_v61  ;;  %v1077_v2 = vadd.f32 %v1076_v63, %v1034_v62  ;;  %v1036_v3 = vadd.f32 %v1035_v0, %v670_v52  ;;  %v1078_v6 = vpop.f32.mrf.mxu1 }
 0x200   :  { %v1037_v8 = vpop.f32.mrf.mxu0 }
 0x201   :  { %vm1084_vm9 = vcmp.gt.f32.partialorder %v1077_v2, 0.0  ;;  %v1088_v11 = vmul.f32 0.2, %v1077_v2  ;;  %v1079_v12 = vadd.f32 %v1078_v6, %v1036_v3  ;;  %v1038_v13 = vadd.f32 %v1037_v8, %v674_v54  ;;  %v1080_v4 = vpop.f32.mrf.mxu1 }
 0x202   :  { %v1091_v9 = vsel %vm1083_vm8, %v1075_v61, %v1087_v1 }
 0x203   :  { %vm1085_vm10 = vcmp.gt.f32.partialorder %v1079_v12, 0.0  ;;  %v1089_v14 = vmul.f32 0.2, %v1079_v12  ;;  %v1081_v15 = vadd.f32 %v1080_v4, %v1038_v13  ;;  %v1092_v16 = vsel %vm1084_vm9, %v1077_v2, %v1088_v11 }
 0x204   :  { %v1116_v17 = vmul.f32 %v1111_v7, %v1091_v9  ;;  %v1117_v18 = vmul.f32 %v1115_v10, %v1092_v16 }
 0x205   :  { %vm1086_vm11 = vcmp.gt.f32.partialorder %v1081_v15, 0.0  ;;  %v1090_v19 = vmul.f32 0.2, %v1081_v15  ;;  %v1093_v20 = vsel %vm1085_vm10, %v1079_v12, %v1089_v14 }
 0x206   :  { %v1120_v21 = vadd.f32 %v1117_v18, %v1116_v17  ;;  %v1118_v23 = vmul.f32 %v1111_v7, %v1093_v20 }
 0x207   :  { %v1094_v22 = vsel %vm1086_vm11, %v1081_v15, %v1090_v19 }
 0x208   :  { %1121 = vadd.xlane.f32.xlu0 %v1120_v21  ;;  %v1119_v5 = vmul.f32 %v1115_v10, %v1094_v22 }
 0x20a   :  { %v1123_v24 = vadd.f32 %v1119_v5, %v1118_v23 }
 0x20c   :  { %1124 = vadd.xlane.f32.xlu0 %v1123_v24 }
 0x291   :  { %v1122_v26 = vpop.xlane.xlu0 %1121 }
 0x292   :  { %v1133_v27 = vadd.f32 %v1286_v25, %v1122_v26 }
 0x294   :  { %v1287_v28 = vmul.f32 -1.442695, %v1133_v27 }
 0x295   :  { %v1125_v29 = vpop.xlane.xlu0 %1124 }
 0x296   :  { %1491 = vpow2.f32 %v1287_v28  ;;  %v1134_v30 = vadd.f32 %v1286_v25, %v1125_v29 }
 0x298   :  { %v1288_v31 = vmul.f32 -1.442695, %v1134_v30 }
 0x29a   :  { %1493 = vpow2.f32 %v1288_v31 }
 0x2a3   :  { %v1492_v32 = vpop.eup %1491 }
 0x2a4   :  { %v1141_v33 = vadd.f32 1.0, %v1492_v32 }
 0x2a6   :  { %1495 = vrcp.f32 %v1141_v33 }
 0x2a7   :  { %v1494_v34 = vpop.eup %1493 }
 0x2a8   :  { %v1142_v35 = vadd.f32 1.0, %v1494_v34 }
 0x2aa   :  { %1497 = vrcp.f32 %v1142_v35 }
 0x2b3   :  { %v1496_v36 = vpop.eup %1495 }
 0x2b4   :  { %1148 = vst.msk [vmem:[%s1662_s7] sm:$0xff] %vm1147_vm12, %v1496_v36 }
 0x2b7   :  { %v1498_v37 = vpop.eup %1497 }
 0x2b8   :  { %1149 = vst.msk [vmem:[%s1662_s7 + $0x8] sm:$0xff] %vm1147_vm12, %v1498_v37 }
 0x2b9   :  { %1154 = vsyncpa [#allocation4], 1 }
 0x2ba   :  { %1155 = vsyncpa [#allocation6], 1 }

</bundles_post_ra>
